<compile_context>
chip_gen: v7x
topology: tpu7x:2x2x1
jax: 0.10.0
libtpu: 0.0.40
codegen_flags: <defaults>
</compile_context>

<pallas_src>
import jax
import jax.numpy as jnp
from jax.experimental import pallas as pl
from jax.experimental.pallas import tpu as pltpu


def _round_up(x, m):
    return (x + m - 1) // m * m


def _loss_kernel(x_ref, t_ref, w_ref, num_ref, den_ref):
    # x_ref: (2, R, 128) f32  -- class-0 / class-1 logit planes, lane-dense
    # t_ref: (R, 128)    i8   -- targets, -1 = ignore (padding rows are -1)
    # w_ref: (2,)        f32  -- per-class weights, in SMEM
    x0 = x_ref[0]                                  # (R, 128)
    x1 = x_ref[1]
    t = t_ref[...].astype(jnp.int32)               # cheap unpack

    # --- softmax over the 2 classes == sigmoid(x1 - x0), numerically stable ---
    d = x1 - x0
    e = jnp.exp(-jnp.abs(d))                       # EUP 1
    inv = pl.reciprocal(1.0 + e, approx=False)     # exact: keep 1e-5 tolerance
    p1 = jnp.where(d >= 0, inv, 1.0 - inv)         # sigmoid(d)
    p0 = 1.0 - p1

    # --- log_softmax of the softmax output (what CrossEntropyLoss applies).
    # p in [0, 1] so exp cannot overflow -> no max-stabilization needed.
    # Only the selected log-prob is formed.
    lse = jnp.log(jnp.exp(p0) + jnp.exp(p1))       # EUP 2, 3, 4
    picked = jnp.where(t == 0, p0, p1) - lse       # junk where t == -1; wt = 0 there

    # --- weighted NLL with ignore_index = -1 ---
    w0 = w_ref[0]
    w1 = w_ref[1]
    wt = jnp.where(t == 0, w0, jnp.where(t == 1, w1, 0.0))
    num_c = -(wt * picked)                         # per-element numerator contribs

    # Fold sublane groups into a lane-dense (8,128) partial slab (pure VPU adds,
    # no cross-lane XLU reduce; the (R,128)->(R//8,8,128) reshape is tile-aligned).
    num_ref[...] = jnp.sum(num_c.reshape(-1, 8, 128), axis=0)[None]
    den_ref[...] = jnp.sum(wt.reshape(-1, 8, 128), axis=0)[None]


def loss_forward(inp, target, loss_weight, *, max_tile_rows=4096):
    """inp: (N, 2) logits, target: (N,) int (class id or -1), loss_weight: (2,)."""
    n, c = inp.shape
    assert c == 2, "kernel is specialized for the 2-class Loss module"

    rows = -(-n // 128)                               # number of 128-lane rows
    r = min(max_tile_rows, _round_up(rows, 32))       # tile rows; mult. of 32 (i8 tile)
    rows_p = _round_up(rows, r)
    n_p = rows_p * 128
    num_tiles = rows_p // r

    x = inp.astype(jnp.float32)
    t = target.astype(jnp.int8)                       # {-1, 0, 1} fits; 4x less DMA
    if n_p != n:
        pad = n_p - n
        x = jnp.pad(x, ((0, pad), (0, 0)))                    # padded logits: 0 (finite)
        t = jnp.pad(t, ((0, pad),), constant_values=-1)       # padded rows ignored

    # (N, 2) -> (2, rows, 128): class planes, rows lane-dense; (rows,128) targets.
    # TODO(synk): this transpose is one extra XLA HBM pass; a fully zero-copy
    # interleaved (rows, 256) layout would need an in-kernel lane de-interleave.
    x = jnp.transpose(x).reshape(2, rows_p, 128)
    t = t.reshape(rows_p, 128)
    w = loss_weight.astype(jnp.float32).reshape(2)

    num_p, den_p = pl.pallas_call(
        _loss_kernel,
        grid=(num_tiles,),
        in_specs=[
            pl.BlockSpec((2, r, 128), lambda i: (0, i, 0)),
            pl.BlockSpec((r, 128), lambda i: (i, 0)),
            pl.BlockSpec(memory_space=pltpu.MemorySpace.SMEM),
        ],
        out_specs=[
            pl.BlockSpec((1, 8, 128), lambda i: (i, 0, 0)),
            pl.BlockSpec((1, 8, 128), lambda i: (i, 0, 0)),
        ],
        out_shape=[
            jax.ShapeDtypeStruct((num_tiles, 8, 128), jnp.float32),
            jax.ShapeDtypeStruct((num_tiles, 8, 128), jnp.float32),
        ],
        compiler_params=pltpu.CompilerParams(
            dimension_semantics=("parallel",)),
    )(x, t, w)

    # Final reduction and the single scalar division stay in XLA.
    return jnp.sum(num_p) / jnp.sum(den_p)


def _reference(inp, target, loss_weight):
    """Pure-JAX reference mirroring PyTorch semantics (verification only)."""
    p = jax.nn.softmax(inp.astype(jnp.float32), axis=1)
    logp = jax.nn.log_softmax(p, axis=1)
    valid = target != -1
    t_safe = jnp.where(valid, target, 0)
    picked = jnp.take_along_axis(logp, t_safe[:, None], axis=1)[:, 0]
    wt = loss_weight[t_safe] * valid.astype(jnp.float32)
    return -jnp.sum(wt * picked) / jnp.sum(wt)


if __name__ == "__main__":
    N, C = 8, 2
    key = jax.random.PRNGKey(0)
    k_inp, k_tgt = jax.random.split(key)

    inp = jax.random.normal(k_inp, (N, C), dtype=jnp.float32)
    # targets in {-1, 0, 1}: includes ignored entries
    target = jax.random.randint(k_tgt, (N,), minval=-1, maxval=C, dtype=jnp.int32)
    loss_weight = jnp.array([0.05, 0.95], dtype=jnp.float32)

    out = loss_forward(inp, target, loss_weight)
    out = jax.block_until_ready(out)

    ref = jax.block_until_ready(_reference(inp, target, loss_weight))
    assert jnp.allclose(out, ref, atol=1e-5, rtol=1e-5), (out, ref)

    print("KERNEL_OK")
</pallas_src>

<mosaic_0001>
module attributes {stable_mosaic.version = 11 : i64} {
  func.func @_loss_kernel(%arg0: i32, %arg1: memref<2x32x128xf32, #tpu.memory_space<vmem>>, %arg2: memref<32x128xi8, #tpu.memory_space<vmem>>, %arg3: memref<2xf32, #tpu.memory_space<smem>>, %arg4: memref<1x8x128xf32, #tpu.memory_space<vmem>>, %arg5: memref<1x8x128xf32, #tpu.memory_space<vmem>>) attributes {dimension_semantics = [#tpu.dimension_semantics<parallel>], iteration_bounds = array<i64: 1>, scalar_prefetch = 0 : i64, scratch_operands = 0 : i64, tpu.core_type = #tpu.core_type<tc>, window_params = [{transform_indices = @transform_0, window_bounds = array<i64: 2, 32, 128>}, {transform_indices = @transform_1, window_bounds = array<i64: 32, 128>}, {transform_indices = @transform_2, window_bounds = array<i64: 2>}, {transform_indices = @transform_3, window_bounds = array<i64: 1, 8, 128>}, {transform_indices = @transform_4, window_bounds = array<i64: 1, 8, 128>}]} {
    %c0 = arith.constant 0 : index
    %c0_0 = arith.constant 0 : index
    %c0_1 = arith.constant 0 : index
    %0 = vector.load %arg1[%c0, %c0_0, %c0_1] : memref<2x32x128xf32, #tpu.memory_space<vmem>>, vector<1x32x128xf32>
    %1 = vector.shape_cast %0 : vector<1x32x128xf32> to vector<32x128xf32>
    %c1 = arith.constant 1 : index
    %c0_2 = arith.constant 0 : index
    %c0_3 = arith.constant 0 : index
    %2 = vector.load %arg1[%c1, %c0_2, %c0_3] : memref<2x32x128xf32, #tpu.memory_space<vmem>>, vector<1x32x128xf32>
    %3 = vector.shape_cast %2 : vector<1x32x128xf32> to vector<32x128xf32>
    %c0_4 = arith.constant 0 : index
    %c0_5 = arith.constant 0 : index
    %4 = vector.load %arg2[%c0_4, %c0_5] : memref<32x128xi8, #tpu.memory_space<vmem>>, vector<32x128xi8>
    %5 = arith.extsi %4 : vector<32x128xi8> to vector<32x128xi32>
    %6 = arith.subf %3, %1 : vector<32x128xf32>
    %7 = math.absf %6 : vector<32x128xf32>
    %cst = arith.constant 0.000000e+00 : f32
    %8 = vector.broadcast %cst : f32 to vector<32x128xf32>
    %9 = arith.subf %8, %7 : vector<32x128xf32>
    %10 = math.exp %9 : vector<32x128xf32>
    %cst_6 = arith.constant 1.000000e+00 : f32
    %11 = vector.broadcast %cst_6 : f32 to vector<32x128xf32>
    %12 = arith.addf %11, %10 : vector<32x128xf32>
    %13 = tpu.reciprocal %12 : vector<32x128xf32> -> vector<32x128xf32>
    %cst_7 = arith.constant 0.000000e+00 : f32
    %14 = vector.broadcast %cst_7 : f32 to vector<32x128xf32>
    %15 = arith.cmpf oge, %6, %14 : vector<32x128xf32>
    %cst_8 = arith.constant 1.000000e+00 : f32
    %16 = vector.broadcast %cst_8 : f32 to vector<32x128xf32>
    %17 = arith.subf %16, %13 : vector<32x128xf32>
    %18 = arith.select %15, %13, %17 : vector<32x128xi1>, vector<32x128xf32>
    %cst_9 = arith.constant 1.000000e+00 : f32
    %19 = vector.broadcast %cst_9 : f32 to vector<32x128xf32>
    %20 = arith.subf %19, %18 : vector<32x128xf32>
    %21 = math.exp %20 : vector<32x128xf32>
    %22 = math.exp %18 : vector<32x128xf32>
    %23 = arith.addf %21, %22 : vector<32x128xf32>
    %24 = math.log %23 : vector<32x128xf32>
    %c0_i32 = arith.constant 0 : i32
    %25 = vector.broadcast %c0_i32 : i32 to vector<32x128xi32>
    %26 = arith.cmpi eq, %5, %25 : vector<32x128xi32>
    %27 = arith.select %26, %20, %18 : vector<32x128xi1>, vector<32x128xf32>
    %28 = arith.subf %27, %24 : vector<32x128xf32>
    %c0_10 = arith.constant 0 : index
    %29 = memref.load %arg3[%c0_10] : memref<2xf32, #tpu.memory_space<smem>>
    %c1_11 = arith.constant 1 : index
    %30 = memref.load %arg3[%c1_11] : memref<2xf32, #tpu.memory_space<smem>>
    %c0_i32_12 = arith.constant 0 : i32
    %31 = vector.broadcast %c0_i32_12 : i32 to vector<32x128xi32>
    %32 = arith.cmpi eq, %5, %31 : vector<32x128xi32>
    %c1_i32 = arith.constant 1 : i32
    %33 = vector.broadcast %c1_i32 : i32 to vector<32x128xi32>
    %34 = arith.cmpi eq, %5, %33 : vector<32x128xi32>
    %cst_13 = arith.constant 0.000000e+00 : f32
    %35 = vector.broadcast %30 : f32 to vector<32x128xf32>
    %36 = vector.broadcast %cst_13 : f32 to vector<32x128xf32>
    %37 = arith.select %34, %35, %36 : vector<32x128xi1>, vector<32x128xf32>
    %38 = vector.broadcast %29 : f32 to vector<32x128xf32>
    %39 = arith.select %32, %38, %37 : vector<32x128xi1>, vector<32x128xf32>
    %40 = arith.mulf %39, %28 : vector<32x128xf32>
    %cst_14 = arith.constant 0.000000e+00 : f32
    %41 = vector.broadcast %cst_14 : f32 to vector<32x128xf32>
    %42 = arith.subf %41, %40 : vector<32x128xf32>
    %43 = vector.shape_cast %42 : vector<32x128xf32> to vector<4x8x128xf32>
    %cst_15 = arith.constant dense<0.000000e+00> : vector<8x128xf32>
    %44 = vector.multi_reduction <add>, %43, %cst_15 [0] : vector<4x8x128xf32> to vector<8x128xf32>
    %45 = vector.shape_cast %44 : vector<8x128xf32> to vector<1x8x128xf32>
    %c0_16 = arith.constant 0 : index
    %c0_17 = arith.constant 0 : index
    %c0_18 = arith.constant 0 : index
    %46 = vector.load %arg4[%c0_16, %c0_17, %c0_18] : memref<1x8x128xf32, #tpu.memory_space<vmem>>, vector<1x8x128xf32>
    tpu.vector_store %arg4[%c0_16, %c0_17, %c0_18], %45 {strides = array<i32>} : memref<1x8x128xf32, #tpu.memory_space<vmem>>, vector<1x8x128xf32>,
    %47 = vector.shape_cast %39 : vector<32x128xf32> to vector<4x8x128xf32>
    %cst_19 = arith.constant dense<0.000000e+00> : vector<8x128xf32>
    %48 = vector.multi_reduction <add>, %47, %cst_19 [0] : vector<4x8x128xf32> to vector<8x128xf32>
    %49 = vector.shape_cast %48 : vector<8x128xf32> to vector<1x8x128xf32>
    %c0_20 = arith.constant 0 : index
    %c0_21 = arith.constant 0 : index
    %c0_22 = arith.constant 0 : index
    %50 = vector.load %arg5[%c0_20, %c0_21, %c0_22] : memref<1x8x128xf32, #tpu.memory_space<vmem>>, vector<1x8x128xf32>
    tpu.vector_store %arg5[%c0_20, %c0_21, %c0_22], %49 {strides = array<i32>} : memref<1x8x128xf32, #tpu.memory_space<vmem>>, vector<1x8x128xf32>,
    return
  }
  func.func @transform_0(%arg0: i32) -> (i32, i32, i32) {
    %c0_i32 = arith.constant 0 : i32
    %c0_i32_0 = arith.constant 0 : i32
    %c0_i32_1 = arith.constant 0 : i32
    return %c0_i32, %arg0, %c0_i32_0 : i32, i32, i32
  }
  func.func @transform_1(%arg0: i32) -> (i32, i32) {
    %c0_i32 = arith.constant 0 : i32
    %c0_i32_0 = arith.constant 0 : i32
    return %arg0, %c0_i32 : i32, i32
  }
  func.func @transform_2(%arg0: i32) -> i32 {
    %c0_i32 = arith.constant 0 : i32
    %c0_i32_0 = arith.constant 0 : i32
    return %c0_i32 : i32
  }
  func.func @transform_3(%arg0: i32) -> (i32, i32, i32) {
    %c0_i32 = arith.constant 0 : i32
    %c0_i32_0 = arith.constant 0 : i32
    %c0_i32_1 = arith.constant 0 : i32
    return %arg0, %c0_i32, %c0_i32_0 : i32, i32, i32
  }
  func.func @transform_4(%arg0: i32) -> (i32, i32, i32) {
    %c0_i32 = arith.constant 0 : i32
    %c0_i32_0 = arith.constant 0 : i32
    %c0_i32_1 = arith.constant 0 : i32
    return %arg0, %c0_i32, %c0_i32_0 : i32, i32, i32
  }
}

</mosaic_0001>

<bundles_post_ra>
// kernel: tpu_custom_call.1
= control target key start
LH: loop header
LB: loop body
LE: loop exit
PB: predicated region body
PF: predicated region fallthrough
CT: control target
= control target key end

     0   :  { %10 = vsyncpa [#allocation3], 0  ;;  %s547_s0 = inlined_call_operand.hbm [shape: f32[2,32,128], index: 0, kind: input, shape index: {}]   ;;  %s548_s1 = inlined_call_operand.hbm [shape: s8[32,128], index: 1, kind: input, shape index: {}]   ;;  %s549_s2 = inlined_call_operand.vmem [shape: f32[2], index: 2, kind: input, shape index: {}]   ;;  %s550_s3 = inlined_call_operand.hbm [shape: f32[1,8,128], index: 3, kind: output, shape index: {0}]   ;;  %s551_s4 = inlined_call_operand.hbm [shape: f32[1,8,128], index: 4, kind: output, shape index: {1}]  }
   0x1   :  { %11 = vsyncpa [#allocation7], 0 }
   0x2   :  { %12 = vsyncpa [#allocation5], 0 }
   0x3   :  { %13 = vsyncpa [#allocation4], 0 }
   0x4   :  { %14 = vsyncpa [#allocation11], 0  ;;  %s376_s15 = smov [#allocation2]   ;;  %s266_s19 = scalar_lea.hbm %s547_s0, 1024 }
   0x5   :  { %s20_s16 = sshll.u32 %s376_s15, 4  ;;  %p267_p0 = scmp.ne.s32.totalorder %s547_s0, %s266_s19  ;;  %s21_s16 = int_to_ptr.vmem [resolvable:$true] %s20_s16 }
   0x6   :  { %p270_p1 = scmp.lt.u32.totalorder %s266_s19, %s547_s0 }
   0x8   :  { %p272_p2 = pnand %p270_p1, %p267_p0 }
   0xa   :  { %275 = shalt.err (!%p272_p2)
}
   0xb   :  { %s276_s24 = scalar_lea.vmem %s21_s16, 1024  ;;  %p281_p4 = scmp.lt.s32.totalorder %s21_s16, %s21_s16 }
   0xc   :  { %p277_p3 = scmp.ne.s32.totalorder %s21_s16, %s276_s24  ;;  %p282_p5 = scmp.lt.s32.totalorder %s276_s24, %s276_s24 }
   0xe   :  { %p283_p6 = por %p282_p5, %p281_p4 }
  0x10   :  { %p284_p7 = pnand %p283_p6, %p277_p3 }
  0x12   :  { %287 = shalt.err (!%p284_p7)
}
  0x13   :  { %s377_s25 = smov 128   ;;  %s378_s26 = smov 8  }
  0x14   :  { %26 = dma.hbm_to_vmem [thread:$0]  %s547_s0, 1024, %s21_s16, [#allocation3], %s377_s25, %s377_s25, %s378_s26  }
  0x15   :  { %s379_s29 = smov [#allocation6]   ;;  %s43_s7 = sshll.u32 %s549_s2, 4  ;;  %s44_s7 = int_to_ptr.vmem [resolvable:$true] %s43_s7 }
  0x16   :  { %s33_s30 = sshll.u32 %s379_s29, 4  ;;  %s288_s10 = scalar_lea.hbm %s548_s1, 128  ;;  %s34_s30 = int_to_ptr.vmem [resolvable:$true] %s33_s30 }
  0x17   :  { %p289_p8 = scmp.ne.s32.totalorder %s548_s1, %s288_s10  ;;  %p292_p9 = scmp.lt.u32.totalorder %s288_s10, %s548_s1 }
  0x19   :  { %p294_p10 = pnand %p292_p9, %p289_p8 }
  0x1b   :  { %297 = shalt.err (!%p294_p10)
}
  0x1c   :  { %s298_s0 = scalar_lea.vmem %s34_s30, 128  ;;  %p303_p12 = scmp.lt.s32.totalorder %s34_s30, %s34_s30 }
  0x1d   :  { %p299_p11 = scmp.ne.s32.totalorder %s34_s30, %s298_s0  ;;  %p304_p13 = scmp.lt.s32.totalorder %s298_s0, %s298_s0 }
  0x1f   :  { %p305_p0 = por %p304_p13, %p303_p12 }
  0x21   :  { %p306_p1 = pnand %p305_p0, %p299_p11 }
  0x23   :  { %309 = shalt.err (!%p306_p1)
}
  0x24   :  { %36 = dma.hbm_to_vmem [thread:$0]  %s548_s1, 128, %s34_s30, [#allocation7]  }
  0x25   :  { %s310_s16 = scalar_lea.vmem %s44_s7, 16  ;;  %p315_p3 = scmp.lt.s32.totalorder %s44_s7, %s44_s7 }
  0x26   :  { %p311_p2 = scmp.ne.s32.totalorder %s44_s7, %s310_s16  ;;  %p316_p4 = scmp.lt.s32.totalorder %s310_s16, %s310_s16 }
  0x28   :  { %p317_p5 = por %p316_p4, %p315_p3 }
  0x2a   :  { %p318_p6 = pnand %p317_p5, %p311_p2 }
  0x2c   :  { %321 = shalt.err (!%p318_p6)
}
  0x2d   :  { %s380_s17 = smov [#allocation8]  }
  0x2e   :  { %46 = dma.vmem_to_smem %s44_s7, 16, %s380_s17, [#allocation5]  }
  0x2f   :  { %366 = dma.done.wait [#allocation3], 1024  }
  0x30   :  { %367 = vsyncadd [#allocation3], 4294966272 }
  0x31   :  { %368 = dma.done.wait [#allocation7], 128  }
  0x32   :  { %369 = vsyncadd [#allocation7], 4294967168 }
  0x33   :  { %370 = dma.done.wait [#allocation5], 16  }
  0x34   :  { %371 = vsyncadd [#allocation5], 4294967280 }
  0x35   :  { %56 = sfence }
  0x36   :  { %v57_v0 = vld [vmem:[#allocation2] sm:$0xff]  ;;  %v58_v1 = vld [vmem:[#allocation2 + $0x8] sm:$0xff]  ;;  %v59_v2 = vld [vmem:[#allocation2 + $0x10] sm:$0xff]  ;;  %s218_s1 = sld [smem:[#allocation8 + $0x1]]  ;;  %s155_s18 = sld [smem:[#allocation8]] }
  0x37   :  { %v60_v3 = vld [vmem:[#allocation2 + $0x18] sm:$0xff]  ;;  %v62_v4 = vld [vmem:[#allocation2 + $0x20] sm:$0xff]  ;;  %v63_v5 = vld [vmem:[#allocation2 + $0x28] sm:$0xff]  ;;  %s381_s19 = smov [#allocation10]  }
  0x38   :  { %v64_v6 = vld [vmem:[#allocation2 + $0x30] sm:$0xff]  ;;  %v65_v7 = vld [vmem:[#allocation2 + $0x38] sm:$0xff]  ;;  %v66_v8 = vld [vmem:[#allocation6] sm:$0xff]  ;;  %v435_v9 = vsub.f32 %v62_v4, %v57_v0  ;;  %v437_v10 = vsub.f32 %v63_v5, %v58_v1  ;;  %s203_s20 = sshll.u32 %s381_s19, 4  ;;  %s204_s20 = int_to_ptr.vmem [resolvable:$true] %s203_s20 }
  0x39   :  { %v439_v11 = vsub.f32 %v64_v6, %v59_v2  ;;  %v441_v12 = vsub.f32 %v65_v7, %v60_v3  ;;  %v67_v15 = vunpack.c.0.s8 %v66_v8  ;;  %v68_v16 = vunpack.c.1.s8 %v66_v8  ;;  %s322_s21 = scalar_lea.vmem %s204_s20, 128  ;;  %p327_p8 = scmp.lt.s32.totalorder %s204_s20, %s204_s20 }
  0x3a   :  { %v75_v13 = vand.u32 2147483647, %v435_v9  ;;  %v76_v14 = vand.u32 2147483647, %v437_v10  ;;  %v69_v17 = vunpack.c.2.s8 %v66_v8  ;;  %v70_v22 = vunpack.c.3.s8 %v66_v8  ;;  %p323_p7 = scmp.ne.s32.totalorder %s204_s20, %s322_s21  ;;  %p328_p9 = scmp.lt.s32.totalorder %s322_s21, %s322_s21 }
  0x3b   :  { %v77_v18 = vand.u32 2147483647, %v439_v11  ;;  %v78_v19 = vand.u32 2147483647, %v441_v12  ;;  %vm447_vm0 = vcmp.eq.s32.totalorder %v67_v15, 0  ;;  %vm451_vm1 = vcmp.eq.s32.totalorder %v67_v15, 1 }
  0x3c   :  { %v79_v20 = vsub.f32 0.0, %v75_v13  ;;  %v80_v21 = vsub.f32 0.0, %v76_v14  ;;  %vm455_vm2 = vcmp.eq.s32.totalorder %v68_v16, 1  ;;  %vm459_vm3 = vcmp.eq.s32.totalorder %v69_v17, 1  ;;  %p329_p10 = por %p328_p9, %p327_p8 }
  0x3d   :  { %v81_v23 = vsub.f32 0.0, %v77_v18  ;;  %v82_v24 = vsub.f32 0.0, %v78_v19  ;;  %v161_v33 = vstv %s218_s1  ;;  %vm463_vm4 = vcmp.eq.s32.totalorder %v70_v22, 1 }
  0x3e   :  { %v83_v25 = vmul.f32 1.442695, %v79_v20  ;;  %v85_v26 = vmul.f32 1.442695, %v80_v21  ;;  %v162_v35 = vsel %vm451_vm1, %v161_v33, 0.0  ;;  %v163_v36 = vsel %vm455_vm2, %v161_v33, 0.0  ;;  %p330_p11 = pnand %p329_p10, %p323_p7 }
  0x3f   :  { %v87_v31 = vmul.f32 1.442695, %v81_v23  ;;  %v89_v32 = vmul.f32 1.442695, %v82_v24  ;;  %vm471_vm5 = vcmp.eq.s32.totalorder %v68_v16, 0  ;;  %v164_v38 = vsel %vm459_vm3, %v161_v33, 0.0 }
  0x40   :  { %226 = vpow2.f32 %v83_v25  ;;  %v166_v39 = vstv %s155_s18  ;;  %vm485_vm6 = vcmp.eq.s32.totalorder %v69_v17, 0  ;;  %v165_v43 = vsel %vm463_vm4, %v161_v33, 0.0 }
  0x41   :  { %228 = vpow2.f32 %v85_v26  ;;  %v479_v40 = vsel %vm447_vm0, %v166_v39, %v162_v35  ;;  %v483_v41 = vsel %vm471_vm5, %v166_v39, %v163_v36  ;;  %v495_v45 = vsel %vm485_vm6, %v166_v39, %v164_v38 }
  0x42   :  { %230 = vpow2.f32 %v87_v31  ;;  %v183_v44 = vadd.f32 %v483_v41, %v479_v40  ;;  %vm497_vm7 = vcmp.eq.s32.totalorder %v70_v22, 0 }
  0x43   :  { %232 = vpow2.f32 %v89_v32  ;;  %v504_v48 = vsel %vm497_vm7, %v166_v39, %v165_v43 }
  0x44   :  { %v184_v47 = vadd.f32 %v183_v44, %v495_v45 }
  0x46   :  { %v185_v49 = vadd.f32 %v184_v47, %v504_v48 }
  0x48   :  { %186 = vst [vmem:[#allocation10] sm:$0xff] %v185_v49 }
  0x4a   :  { %v227_v50 = vpop.eup %226 }
  0x4b   :  { %v229_v51 = vpop.eup %228  ;;  %v91_v52 = vadd.f32 1.0, %v227_v50 }
  0x4c   :  { %333 = shalt.err (!%p330_p11)
}
  0x4d   :  { %s334_s24 = scalar_lea.hbm %s551_s4, 128 }
  0x4e   :  { %p335_p12 = scmp.ne.s32.totalorder %s551_s4, %s334_s24  ;;  %p338_p13 = scmp.lt.u32.totalorder %s334_s24, %s551_s4 }
  0x50   :  { %p340_p0 = pnand %p338_p13, %p335_p12 }
  0x52   :  { %343 = shalt.err (!%p340_p0)
}
  0x53   :  { %206 = dma.vmem_to_hbm [thread:$0]  %s204_s20, 128, %s551_s4, [#allocation11]   ;;  %v231_v53 = vpop.eup %230  ;;  %v92_v54 = vadd.f32 1.0, %v229_v51  ;;  %234 = vrcp.f32 %v91_v52  ;;  %vm99_vm8 = vcmp.ge.f32.partialorder %v435_v9, 0.0  ;;  %vm100_vm9 = vcmp.ge.f32.partialorder %v437_v10, 0.0 }
  0x54   :  { %v233_v55 = vpop.eup %232  ;;  %v93_v56 = vadd.f32 1.0, %v231_v53  ;;  %vm101_vm10 = vcmp.ge.f32.partialorder %v439_v11, 0.0  ;;  %vm102_vm11 = vcmp.ge.f32.partialorder %v441_v12, 0.0  ;;  %s382_s4 = smov [#allocation9]  }
  0x55   :  { %v94_v57 = vadd.f32 1.0, %v233_v55  ;;  %236 = vrcp.f32 %v92_v54  ;;  %s193_s5 = sshll.u32 %s382_s4, 4  ;;  %s194_s5 = int_to_ptr.vmem [resolvable:$true] %s193_s5 }
  0x56   :  { %238 = vrcp.f32 %v93_v56  ;;  %s344_s6 = scalar_lea.vmem %s194_s5, 128  ;;  %p349_p2 = scmp.lt.s32.totalorder %s194_s5, %s194_s5 }
  0x57   :  { %240 = vrcp.f32 %v94_v57  ;;  %p345_p1 = scmp.ne.s32.totalorder %s194_s5, %s344_s6  ;;  %p350_p3 = scmp.lt.s32.totalorder %s344_s6, %s344_s6 }
  0x59   :  { %p351_p4 = por %p350_p3, %p349_p2 }
  0x5b   :  { %p352_p5 = pnand %p351_p4, %p345_p1 }
  0x5d   :  { %v235_v58 = vpop.eup %234 }
  0x5e   :  { %v103_v60 = vsub.f32 1.0, %v235_v58 }
  0x5f   :  { %v237_v59 = vpop.eup %236 }
  0x60   :  { %v239_v61 = vpop.eup %238  ;;  %v104_v62 = vsub.f32 1.0, %v237_v59  ;;  %v107_v1 = vsel %vm99_vm8, %v235_v58, %v103_v60 }
  0x61   :  { %v241_v63 = vpop.eup %240  ;;  %v105_v0 = vsub.f32 1.0, %v239_v61  ;;  %v111_v4 = vsub.f32 1.0, %v107_v1  ;;  %v123_v5 = vmul.f32 1.442695, %v107_v1 }
  0x62   :  { %v106_v2 = vsub.f32 1.0, %v241_v63  ;;  %v108_v3 = vsel %vm100_vm9, %v237_v59, %v104_v62 }
  0x63   :  { %v109_v6 = vsel %vm101_vm10, %v239_v61, %v105_v0  ;;  %v112_v7 = vsub.f32 1.0, %v108_v3  ;;  %v125_v8 = vmul.f32 1.442695, %v108_v3  ;;  %v115_v10 = vmul.f32 1.442695, %v111_v4 }
  0x64   :  { %v110_v9 = vsel %vm102_vm11, %v241_v63, %v106_v2  ;;  %v113_v13 = vsub.f32 1.0, %v109_v6  ;;  %242 = vpow2.f32 %v123_v5  ;;  %v127_v16 = vmul.f32 1.442695, %v109_v6 }
  0x65   :  { %v114_v14 = vsub.f32 1.0, %v110_v9  ;;  %v117_v15 = vmul.f32 1.442695, %v112_v7  ;;  %244 = vpow2.f32 %v125_v8  ;;  %v129_v17 = vmul.f32 1.442695, %v110_v9 }
  0x66   :  { %246 = vpow2.f32 %v115_v10  ;;  %v119_v11 = vmul.f32 1.442695, %v113_v13  ;;  %v147_v32 = vsel %vm447_vm0, %v111_v4, %v107_v1  ;;  %v148_v35 = vsel %vm471_vm5, %v112_v7, %v108_v3 }
  0x67   :  { %248 = vpow2.f32 %v117_v15  ;;  %v121_v12 = vmul.f32 1.442695, %v114_v14  ;;  %v149_v43 = vsel %vm485_vm6, %v113_v13, %v109_v6  ;;  %v150_v50 = vsel %vm497_vm7, %v114_v14, %v110_v9 }
  0x68   :  { %250 = vpow2.f32 %v119_v11 }
  0x69   :  { %252 = vpow2.f32 %v121_v12 }
  0x6a   :  { %254 = vpow2.f32 %v127_v16 }
  0x6b   :  { %256 = vpow2.f32 %v129_v17 }
  0x6e   :  { %v243_v18 = vpop.eup %242 }
  0x6f   :  { %v245_v19 = vpop.eup %244 }
  0x70   :  { %v247_v20 = vpop.eup %246 }
  0x71   :  { %v249_v21 = vpop.eup %248  ;;  %v131_v22 = vadd.f32 %v247_v20, %v243_v18 }
  0x72   :  { %v251_v23 = vpop.eup %250  ;;  %v132_v24 = vadd.f32 %v249_v21, %v245_v19 }
  0x73   :  { %v253_v25 = vpop.eup %252  ;;  %258 = vlog2.f32 %v131_v22 }
  0x74   :  { %v255_v26 = vpop.eup %254  ;;  %260 = vlog2.f32 %v132_v24 }
  0x75   :  { %v257_v28 = vpop.eup %256  ;;  %v133_v29 = vadd.f32 %v255_v26, %v251_v23 }
  0x76   :  { %v134_v30 = vadd.f32 %v257_v28, %v253_v25 }
  0x77   :  { %262 = vlog2.f32 %v133_v29 }
  0x78   :  { %264 = vlog2.f32 %v134_v30 }
  0x7d   :  { %v259_v31 = vpop.eup %258 }
  0x7e   :  { %v261_v33 = vpop.eup %260  ;;  %v136_v34 = vmul.f32 0.6931472, %v259_v31 }
  0x7f   :  { %v138_v36 = vmul.f32 0.6931472, %v261_v33 }
  0x80   :  { %v151_v38 = vsub.f32 %v147_v32, %v136_v34 }
  0x81   :  { %v263_v39 = vpop.eup %262  ;;  %v152_v44 = vsub.f32 %v148_v35, %v138_v36 }
  0x82   :  { %v265_v47 = vpop.eup %264  ;;  %v140_v49 = vmul.f32 0.6931472, %v263_v39  ;;  %v171_v27 = vmul.f32 %v479_v40, %v151_v38 }
  0x83   :  { %v142_v51 = vmul.f32 0.6931472, %v265_v47  ;;  %v172_v52 = vmul.f32 %v483_v41, %v152_v44 }
  0x84   :  { %v153_v53 = vsub.f32 %v149_v43, %v140_v49  ;;  %v175_v37 = vsub.f32 0.0, %v171_v27 }
  0x85   :  { %v154_v54 = vsub.f32 %v150_v50, %v142_v51  ;;  %v176_v55 = vsub.f32 0.0, %v172_v52 }
  0x86   :  { %v173_v56 = vmul.f32 %v495_v45, %v153_v53 }
  0x87   :  { %v174_v42 = vmul.f32 %v504_v48, %v154_v54  ;;  %v179_v57 = vadd.f32 %v176_v55, %v175_v37 }
  0x88   :  { %v177_v58 = vsub.f32 0.0, %v173_v56 }
  0x89   :  { %v178_v59 = vsub.f32 0.0, %v174_v42 }
  0x8a   :  { %v180_v46 = vadd.f32 %v179_v57, %v177_v58 }
  0x8c   :  { %v181_v60 = vadd.f32 %v180_v46, %v178_v59 }
  0x8e   :  { %182 = vst [vmem:[#allocation9] sm:$0xff] %v181_v60 }
  0x8f   :  { %355 = shalt.err (!%p352_p5)
}
  0x90   :  { %s356_s9 = scalar_lea.hbm %s550_s3, 128 }
  0x91   :  { %p357_p6 = scmp.ne.s32.totalorder %s550_s3, %s356_s9  ;;  %p360_p7 = scmp.lt.u32.totalorder %s356_s9, %s550_s3 }
  0x93   :  { %p362_p8 = pnand %p360_p7, %p357_p6 }
  0x95   :  { %365 = shalt.err (!%p362_p8)
}
  0x96   :  { %196 = dma.vmem_to_hbm [thread:$0]  %s194_s5, 128, %s550_s3, [#allocation4]  }
  0x97   :  { %372 = dma.done.wait [#allocation4], 128  }
  0x98   :  { %373 = vsyncadd [#allocation4], 4294967168 }
  0x99   :  { %374 = dma.done.wait [#allocation11], 128  }
  0x9a   :  { %375 = vsyncadd [#allocation11], 4294967168 }
  0x9b   :  { %213 = vsyncpa [#allocation3], 1 }
  0x9c   :  { %214 = vsyncpa [#allocation7], 1 }
  0x9d   :  { %215 = vsyncpa [#allocation4], 1 }
  0x9e   :  { %216 = vsyncpa [#allocation11], 1 }
  0x9f   :  { %217 = vsyncpa [#allocation5], 1 }

</bundles_post_ra>
